<compile_context>
chip_gen: v6e
topology: v6e:2x2x1
jax: 0.10.0
libtpu: 0.0.40
codegen_flags: <defaults>
</compile_context>

<pallas_src>
import functools

import jax
import jax.numpy as jnp
from jax.experimental import pallas as pl
from jax.experimental.pallas import tpu as pltpu


def _channel_attention_kernel(x_ref, w1t_ref, b1_ref, a_ref, w2t_ref, b2_ref,
                              o_ref, acc_ref, *, inv_hw, chunks, tail):
    """One (n-tile, hw-tile) grid step.

    x_ref : (TN, C, THW)  activation tile (native dtype; accumulated in f32)
    w1t   : (C, Cr)  conv1 weight (pre-transposed)     b1: (1, Cr)
    a     : (1, Cr)  PReLU per-channel slope
    w2t   : (Cr, C)  conv2 weight (pre-transposed)     b2: (1, C)
    o_ref : (TN, C)  written only on the last HW step
    acc   : (TN, C, 128) f32 partial-sum scratch, persistent across the HW axis
    """
    hw_idx = pl.program_id(1)

    @pl.when(hw_idx == 0)
    def _init():
        acc_ref[...] = jnp.zeros_like(acc_ref)

    # --- partial spatial sum for this HW tile -------------------------------
    # Two-stage reduction: accumulate lane-aligned 128-wide chunks with plain
    # VPU adds (loads pushed into the unrolled loop to limit live vreg
    # pressure); the single cross-lane reduce happens once, in the epilogue.
    if chunks > 0:
        psum = x_ref[:, :, 0:128].astype(jnp.float32)
        for k in range(1, chunks):                 # small static unroll
            psum = psum + x_ref[:, :, k * 128:(k + 1) * 128].astype(jnp.float32)
        acc_ref[...] += psum
    if tail > 0:
        # Ragged remainder (< 128 lanes): reduce it now and fold into lane 0.
        t = x_ref[:, :, chunks * 128:chunks * 128 + tail].astype(jnp.float32)
        acc_ref[:, :, 0:1] += jnp.sum(t, axis=-1, keepdims=True)

    # --- epilogue: pool -> conv1 -> PReLU -> conv2 -> sigmoid ----------------
    @pl.when(hw_idx == pl.num_programs(1) - 1)
    def _epilogue():
        # Global average pool: one lane reduce of the 128-wide partial sums,
        # divided by the *true* H*W exactly once.
        pooled = jnp.sum(acc_ref[...], axis=-1) * inv_hw             # (TN, C)
        # conv1 (1x1) == matmul over channels, + bias
        h = jnp.dot(pooled, w1t_ref[...],
                    preferred_element_type=jnp.float32) + b1_ref[...]
        # PReLU with per-channel slope
        h = jnp.where(h > 0, h, a_ref[...] * h)
        # conv2 (1x1) == matmul back to C channels, + bias
        y = jnp.dot(h, w2t_ref[...],
                    preferred_element_type=jnp.float32) + b2_ref[...]
        o_ref[...] = jax.nn.sigmoid(y).astype(o_ref.dtype)


def _choose_hw_tile(hw, n_tile, c, itemsize, budget_bytes):
    """Pick THW: full extent if it fits the byte budget, else the largest
    divisor of HW that is a multiple of 128 and fits the budget."""
    max_elems = max(128, budget_bytes // max(1, n_tile * c * itemsize))
    if hw <= max_elems:
        return hw
    cand = (max_elems // 128) * 128
    while cand >= 128:
        if hw % cand == 0:
            return cand
        cand -= 128
    # No clean 128-multiple divisor: fall back to one full-extent block.
    return hw


def channel_attention(x_nchw, w1, b1, prelu_a, w2, b2, *,
                      hw_tile=None, tile_budget_bytes=4 * 1024 * 1024):
    """BAM ChannelAttention forward.  x_nchw: (N, C, H, W) -> (N, C, 1, 1) f32."""
    N, C, H, W = x_nchw.shape
    Cr = w1.shape[0]
    HW = H * W

    # Keep the activation in its native dtype (no wrapper up-cast): the kernel
    # casts to f32 *after* the VMEM load, so bf16 inputs cost half the HBM reads.
    x_flat = x_nchw.reshape(N, C, HW)

    w1t = w1.reshape(Cr, C).T.astype(jnp.float32)        # (C, Cr)
    w2t = w2.reshape(C, Cr).T.astype(jnp.float32)        # (Cr, C)
    b1_2d = b1.reshape(1, Cr).astype(jnp.float32)
    b2_2d = b2.reshape(1, C).astype(jnp.float32)
    a_2d = prelu_a.reshape(1, Cr).astype(jnp.float32)

    # Batch tile: 8 keeps (TN, C) epilogue tiles f32-sublane aligned when N
    # allows it; a ragged trailing block computes into padding that is dropped.
    TN = min(N, 8)
    grid_n = pl.cdiv(N, TN)

    itemsize = x_flat.dtype.itemsize
    THW = hw_tile if hw_tile is not None else _choose_hw_tile(
        HW, TN, C, itemsize, tile_budget_bytes)
    if THW != HW and (HW % THW != 0 or THW % 128 != 0):
        raise ValueError(f"hw_tile={THW} must divide H*W={HW} and be a multiple of 128")
    grid_hw = 1 if THW == HW else HW // THW

    chunks, tail = divmod(THW, 128)
    kernel = functools.partial(_channel_attention_kernel,
                               inv_hw=1.0 / float(HW), chunks=chunks, tail=tail)

    # VMEM accounting: x tile is double-buffered by the pipeline; add the f32
    # accumulator and slack for the (tiny) weights / bias / output blocks.
    tile_bytes = TN * C * THW * itemsize
    acc_bytes = TN * C * 128 * 4
    needed = 2 * tile_bytes + acc_bytes + (2 << 20)
    vmem_limit = int(min(48 << 20, max(16 << 20, needed)))

    # Advisory cost hint for the XLA scheduler (pooling dominates).
    cost = pl.CostEstimate(
        flops=int(N * C * HW + 4 * N * C * Cr),
        transcendentals=int(N * C),
        bytes_accessed=int(x_flat.size * itemsize + N * C * 4
                           + (w1t.size + w2t.size + b1_2d.size
                              + b2_2d.size + a_2d.size) * 4),
    )

    out = pl.pallas_call(
        kernel,
        out_shape=jax.ShapeDtypeStruct((N, C), jnp.float32),
        grid_spec=pltpu.PrefetchScalarGridSpec(
            num_scalar_prefetch=0,
            grid=(grid_n, grid_hw),
            in_specs=[
                pl.BlockSpec((TN, C, THW), lambda i, j: (i, 0, j)),   # x
                pl.BlockSpec((C, Cr), lambda i, j: (0, 0)),           # w1t
                pl.BlockSpec((1, Cr), lambda i, j: (0, 0)),           # b1
                pl.BlockSpec((1, Cr), lambda i, j: (0, 0)),           # prelu a
                pl.BlockSpec((Cr, C), lambda i, j: (0, 0)),           # w2t
                pl.BlockSpec((1, C), lambda i, j: (0, 0)),            # b2
            ],
            out_specs=pl.BlockSpec((TN, C), lambda i, j: (i, 0)),
            scratch_shapes=[pltpu.VMEM((TN, C, 128), jnp.float32)],
        ),
        compiler_params=pltpu.CompilerParams(
            dimension_semantics=("parallel", "arbitrary"),
            vmem_limit_bytes=vmem_limit,
        ),
        cost_estimate=cost,
    )(x_flat, w1t, b1_2d, a_2d, w2t, b2_2d)

    return out.reshape(N, C, 1, 1)


def channel_attention_ref(x_nchw, w1, b1, prelu_a, w2, b2):
    """Pure-JAX reference mirroring the PyTorch forward (f32 math)."""
    N, C, H, W = x_nchw.shape
    Cr = w1.shape[0]
    pooled = jnp.mean(x_nchw.astype(jnp.float32), axis=(2, 3))        # (N, C)
    h = pooled @ w1.reshape(Cr, C).T.astype(jnp.float32) + b1         # (N, Cr)
    h = jnp.where(h > 0, h, prelu_a * h)
    y = h @ w2.reshape(C, Cr).T.astype(jnp.float32) + b2              # (N, C)
    return jax.nn.sigmoid(y).reshape(N, C, 1, 1)


if __name__ == "__main__":
    key = jax.random.PRNGKey(0)
    kx1, kx2, kx3, k1, kb1, k2, kb2 = jax.random.split(key, 7)

    # Module config: ChannelAttention(channels=64, ratio=16) -> hidden = 4
    C, ratio = 64, 16
    Cr = C // ratio

    w1 = jax.random.normal(k1, (Cr, C, 1, 1), dtype=jnp.float32) * 0.1   # conv1.weight
    b1 = jax.random.normal(kb1, (Cr,), dtype=jnp.float32) * 0.1          # conv1.bias
    prelu_a = jnp.full((Cr,), 0.25, dtype=jnp.float32)                   # PReLU default
    w2 = jax.random.normal(k2, (C, Cr, 1, 1), dtype=jnp.float32) * 0.1   # conv2.weight
    b2 = jax.random.normal(kb2, (C,), dtype=jnp.float32) * 0.1           # conv2.bias

    # Case 1: baseline small shape (single HW block, f32 input).
    x1 = jax.random.normal(kx1, (2, C, 16, 16), dtype=jnp.float32)
    out1 = jax.block_until_ready(channel_attention(x1, w1, b1, prelu_a, w2, b2))
    ref1 = channel_attention_ref(x1, w1, b1, prelu_a, w2, b2)
    assert out1.shape == (2, C, 1, 1)
    assert jnp.allclose(out1, ref1, atol=1e-5, rtol=1e-5), "case 1 mismatch"

    # Case 2: bf16 input with forced HW tiling -> exercises the multi-step
    # accumulator + epilogue path and the native-dtype (half-traffic) load.
    x2 = jax.random.normal(kx2, (2, C, 32, 32), dtype=jnp.float32).astype(jnp.bfloat16)
    out2 = jax.block_until_ready(
        channel_attention(x2, w1, b1, prelu_a, w2, b2, hw_tile=256))
    ref2 = channel_attention_ref(x2, w1, b1, prelu_a, w2, b2)
    assert jnp.allclose(out2, ref2, atol=1e-4, rtol=1e-4), "case 2 mismatch"

    # Case 3: ragged spatial size (H*W = 49, not a multiple of 128) -> tail path.
    x3 = jax.random.normal(kx3, (2, C, 7, 7), dtype=jnp.float32)
    out3 = jax.block_until_ready(channel_attention(x3, w1, b1, prelu_a, w2, b2))
    ref3 = channel_attention_ref(x3, w1, b1, prelu_a, w2, b2)
    assert jnp.allclose(out3, ref3, atol=1e-5, rtol=1e-5), "case 3 mismatch"

    print("KERNEL_OK")
</pallas_src>

<mosaic_0001>
module attributes {stable_mosaic.version = 11 : i64} {
  func.func @_channel_attention_kernel(%arg0: i32, %arg1: i32, %arg2: memref<2x64x256xf32, #tpu.memory_space<vmem>>, %arg3: memref<64x4xf32, #tpu.memory_space<vmem>>, %arg4: memref<1x4xf32, #tpu.memory_space<vmem>>, %arg5: memref<1x4xf32, #tpu.memory_space<vmem>>, %arg6: memref<4x64xf32, #tpu.memory_space<vmem>>, %arg7: memref<1x64xf32, #tpu.memory_space<vmem>>, %arg8: memref<2x64xf32, #tpu.memory_space<vmem>>, %arg9: memref<2x64x128xf32, #tpu.memory_space<vmem>>) attributes {dimension_semantics = [#tpu.dimension_semantics<parallel>, #tpu.dimension_semantics<arbitrary>], iteration_bounds = array<i64: 1, 1>, scalar_prefetch = 0 : i64, scratch_operands = 1 : i64, tpu.core_type = #tpu.core_type<tc>, window_params = [{transform_indices = @transform_0, window_bounds = array<i64: 2, 64, 256>}, {pipeline_mode = #tpu.pipeline_mode<synchronous>, transform_indices = @transform_1, window_bounds = array<i64: 64, 4>}, {pipeline_mode = #tpu.pipeline_mode<synchronous>, transform_indices = @transform_2, window_bounds = array<i64: 1, 4>}, {pipeline_mode = #tpu.pipeline_mode<synchronous>, transform_indices = @transform_3, window_bounds = array<i64: 1, 4>}, {pipeline_mode = #tpu.pipeline_mode<synchronous>, transform_indices = @transform_4, window_bounds = array<i64: 4, 64>}, {pipeline_mode = #tpu.pipeline_mode<synchronous>, transform_indices = @transform_5, window_bounds = array<i64: 1, 64>}, {transform_indices = @transform_6, window_bounds = array<i64: 2, 64>}]} {
    %c0_i32 = arith.constant 0 : i32
    %0 = arith.cmpi eq, %arg1, %c0_i32 : i32
    %1 = arith.extui %0 : i1 to i32
    %c0_i32_0 = arith.constant 0 : i32
    %2 = arith.cmpi ne, %1, %c0_i32_0 : i32
    scf.if %2 {
      %cst = arith.constant 0.000000e+00 : f32
      %12 = vector.broadcast %cst : f32 to vector<2x64x128xf32>
      %c0_13 = arith.constant 0 : index
      %c0_14 = arith.constant 0 : index
      %c0_15 = arith.constant 0 : index
      %13 = vector.load %arg9[%c0_13, %c0_14, %c0_15] : memref<2x64x128xf32, #tpu.memory_space<vmem>>, vector<2x64x128xf32>
      tpu.vector_store %arg9[%c0_13, %c0_14, %c0_15], %12 {strides = array<i32>} : memref<2x64x128xf32, #tpu.memory_space<vmem>>, vector<2x64x128xf32>,
    } else {
    }
    %c0 = arith.constant 0 : index
    %c0_1 = arith.constant 0 : index
    %c0_2 = arith.constant 0 : index
    %3 = vector.load %arg2[%c0, %c0_1, %c0_2] : memref<2x64x256xf32, #tpu.memory_space<vmem>>, vector<2x64x128xf32>
    %c0_3 = arith.constant 0 : index
    %c0_4 = arith.constant 0 : index
    %c128 = arith.constant 128 : index
    %4 = vector.load %arg2[%c0_3, %c0_4, %c128] : memref<2x64x256xf32, #tpu.memory_space<vmem>>, vector<2x64x128xf32>
    %5 = arith.addf %3, %4 : vector<2x64x128xf32>
    %c0_5 = arith.constant 0 : index
    %c0_6 = arith.constant 0 : index
    %c0_7 = arith.constant 0 : index
    %6 = vector.load %arg9[%c0_5, %c0_6, %c0_7] : memref<2x64x128xf32, #tpu.memory_space<vmem>>, vector<2x64x128xf32>
    %7 = arith.addf %6, %5 : vector<2x64x128xf32>
    %c0_8 = arith.constant 0 : index
    %c0_9 = arith.constant 0 : index
    %c0_10 = arith.constant 0 : index
    %8 = vector.load %arg9[%c0_8, %c0_9, %c0_10] : memref<2x64x128xf32, #tpu.memory_space<vmem>>, vector<2x64x128xf32>
    tpu.vector_store %arg9[%c0_8, %c0_9, %c0_10], %7 {strides = array<i32>} : memref<2x64x128xf32, #tpu.memory_space<vmem>>, vector<2x64x128xf32>,
    %c0_i32_11 = arith.constant 0 : i32
    %9 = arith.cmpi eq, %arg1, %c0_i32_11 : i32
    %10 = arith.extui %9 : i1 to i32
    %c0_i32_12 = arith.constant 0 : i32
    %11 = arith.cmpi ne, %10, %c0_i32_12 : i32
    scf.if %11 {
      %c0_13 = arith.constant 0 : index
      %c0_14 = arith.constant 0 : index
      %c0_15 = arith.constant 0 : index
      %12 = vector.load %arg9[%c0_13, %c0_14, %c0_15] : memref<2x64x128xf32, #tpu.memory_space<vmem>>, vector<2x64x128xf32>
      %cst = arith.constant dense<0.000000e+00> : vector<2x64xf32>
      %13 = vector.multi_reduction <add>, %12, %cst [2] : vector<2x64x128xf32> to vector<2x64xf32>
      %cst_16 = arith.constant 3.906250e-03 : f32
      %14 = vector.broadcast %cst_16 : f32 to vector<2x64xf32>
      %15 = arith.mulf %13, %14 : vector<2x64xf32>
      %c0_17 = arith.constant 0 : index
      %c0_18 = arith.constant 0 : index
      %16 = vector.load %arg3[%c0_17, %c0_18] : memref<64x4xf32, #tpu.memory_space<vmem>>, vector<64x4xf32>
      %cst_19 = arith.constant dense<0.000000e+00> : vector<2x4xf32>
      %17 = tpu.matmul %15, %16, %cst_19 {dimension_numbers = #tpu.dot_dimension_numbers<[1], [0], [0], [1], [0, 0, 1, 1], [], []>} : vector<2x64xf32>, vector<64x4xf32>, vector<2x4xf32> -> vector<2x4xf32>
      %c0_20 = arith.constant 0 : index
      %c0_21 = arith.constant 0 : index
      %18 = vector.load %arg4[%c0_20, %c0_21] : memref<1x4xf32, #tpu.memory_space<vmem>>, vector<1x4xf32>
      %19 = vector.broadcast %18 : vector<1x4xf32> to vector<2x4xf32>
      %20 = arith.addf %17, %19 : vector<2x4xf32>
      %cst_22 = arith.constant 0.000000e+00 : f32
      %21 = vector.broadcast %cst_22 : f32 to vector<2x4xf32>
      %22 = arith.cmpf ogt, %20, %21 : vector<2x4xf32>
      %c0_23 = arith.constant 0 : index
      %c0_24 = arith.constant 0 : index
      %23 = vector.load %arg5[%c0_23, %c0_24] : memref<1x4xf32, #tpu.memory_space<vmem>>, vector<1x4xf32>
      %24 = vector.broadcast %23 : vector<1x4xf32> to vector<2x4xf32>
      %25 = arith.mulf %24, %20 : vector<2x4xf32>
      %26 = arith.select %22, %20, %25 : vector<2x4xi1>, vector<2x4xf32>
      %c0_25 = arith.constant 0 : index
      %c0_26 = arith.constant 0 : index
      %27 = vector.load %arg6[%c0_25, %c0_26] : memref<4x64xf32, #tpu.memory_space<vmem>>, vector<4x64xf32>
      %cst_27 = arith.constant dense<0.000000e+00> : vector<2x64xf32>
      %28 = tpu.matmul %26, %27, %cst_27 {dimension_numbers = #tpu.dot_dimension_numbers<[1], [0], [0], [1], [0, 0, 1, 1], [], []>} : vector<2x4xf32>, vector<4x64xf32>, vector<2x64xf32> -> vector<2x64xf32>
      %c0_28 = arith.constant 0 : index
      %c0_29 = arith.constant 0 : index
      %29 = vector.load %arg7[%c0_28, %c0_29] : memref<1x64xf32, #tpu.memory_space<vmem>>, vector<1x64xf32>
      %30 = vector.broadcast %29 : vector<1x64xf32> to vector<2x64xf32>
      %31 = arith.addf %28, %30 : vector<2x64xf32>
      %32 = arith.negf %31 : vector<2x64xf32>
      %33 = math.exp %32 : vector<2x64xf32>
      %cst_30 = arith.constant 1.000000e+00 : f32
      %34 = vector.broadcast %cst_30 : f32 to vector<2x64xf32>
      %35 = arith.addf %34, %33 : vector<2x64xf32>
      %36 = arith.divf %34, %35 : vector<2x64xf32>
      %c0_31 = arith.constant 0 : index
      %c0_32 = arith.constant 0 : index
      %37 = vector.load %arg8[%c0_31, %c0_32] : memref<2x64xf32, #tpu.memory_space<vmem>>, vector<2x64xf32>
      tpu.vector_store %arg8[%c0_31, %c0_32], %36 {strides = array<i32>} : memref<2x64xf32, #tpu.memory_space<vmem>>, vector<2x64xf32>,
    } else {
    }
    return
  }
  func.func @transform_0(%arg0: i32, %arg1: i32) -> (i32, i32, i32) {
    %c0_i32 = arith.constant 0 : i32
    %c0_i32_0 = arith.constant 0 : i32
    return %arg0, %c0_i32, %arg1 : i32, i32, i32
  }
  func.func @transform_1(%arg0: i32, %arg1: i32) -> (i32, i32) {
    %c0_i32 = arith.constant 0 : i32
    %c0_i32_0 = arith.constant 0 : i32
    %c0_i32_1 = arith.constant 0 : i32
    return %c0_i32, %c0_i32_0 : i32, i32
  }
  func.func @transform_2(%arg0: i32, %arg1: i32) -> (i32, i32) {
    %c0_i32 = arith.constant 0 : i32
    %c0_i32_0 = arith.constant 0 : i32
    %c0_i32_1 = arith.constant 0 : i32
    return %c0_i32, %c0_i32_0 : i32, i32
  }
  func.func @transform_3(%arg0: i32, %arg1: i32) -> (i32, i32) {
    %c0_i32 = arith.constant 0 : i32
    %c0_i32_0 = arith.constant 0 : i32
    %c0_i32_1 = arith.constant 0 : i32
    return %c0_i32, %c0_i32_0 : i32, i32
  }
  func.func @transform_4(%arg0: i32, %arg1: i32) -> (i32, i32) {
    %c0_i32 = arith.constant 0 : i32
    %c0_i32_0 = arith.constant 0 : i32
    %c0_i32_1 = arith.constant 0 : i32
    return %c0_i32, %c0_i32_0 : i32, i32
  }
  func.func @transform_5(%arg0: i32, %arg1: i32) -> (i32, i32) {
    %c0_i32 = arith.constant 0 : i32
    %c0_i32_0 = arith.constant 0 : i32
    %c0_i32_1 = arith.constant 0 : i32
    return %c0_i32, %c0_i32_0 : i32, i32
  }
  func.func @transform_6(%arg0: i32, %arg1: i32) -> (i32, i32) {
    %c0_i32 = arith.constant 0 : i32
    %c0_i32_0 = arith.constant 0 : i32
    return %arg0, %c0_i32 : i32, i32
  }
}

</mosaic_0001>

<bundles_post_ra>
// kernel: tpu_custom_call.1
= control target key start
LH: loop header
LB: loop body
LE: loop exit
PB: predicated region body
PF: predicated region fallthrough
CT: control target
= control target key end

     0   :  { %11 = vsyncpa [#allocation4], 0  ;;  %s731_s0 = inlined_call_operand.hbm [shape: f32[2,64,256], index: 0, kind: input, shape index: {}]   ;;  %s732_s1 = inlined_call_operand.vmem [shape: f32[64,4], index: 1, kind: input, shape index: {}]   ;;  %s733_s2 = inlined_call_operand.vmem [shape: f32[1,4], index: 2, kind: input, shape index: {}]   ;;  %s734_s3 = inlined_call_operand.vmem [shape: f32[1,4], index: 3, kind: input, shape index: {}]   ;;  %s735_s4 = inlined_call_operand.vmem [shape: f32[4,64], index: 4, kind: input, shape index: {}]   ;;  %s736_s5 = inlined_call_operand.vmem [shape: f32[1,64], index: 5, kind: input, shape index: {}]   ;;  %s737_s6 = inlined_call_operand.hbm [shape: f32[2,64], index: 6, kind: output, shape index: {}]  }
   0x1   :  { %12 = vsyncpa [#allocation5], 0  ;;  %s636_s21 = smov [#allocation3]  }
   0x2   :  { %s18_s22 = sshll.u32 %s636_s21, 4  ;;  %s19_s22 = int_to_ptr.vmem [resolvable:$true] %s18_s22 }
   0x3   :  { %s600_s23 = scalar_lea.vmem %s19_s22, 4096  ;;  %p605_p1 = scmp.lt.s32.totalorder %s19_s22, %s19_s22 }
   0x4   :  { %p601_p0 = scmp.ne.s32.totalorder %s19_s22, %s600_s23  ;;  %p606_p2 = scmp.lt.s32.totalorder %s600_s23, %s600_s23 }
   0x6   :  { %p607_p3 = por %p606_p2, %p605_p1 }
   0x8   :  { %p608_p4 = pnand %p607_p3, %p601_p0 }
   0xa   :  { %611 = shalt.err (!%p608_p4)
}
   0xb   :  { %s637_s24 = smov 256   ;;  %s638_s25 = smov 16  }
   0xc   :  { %24 = dma.hbm_to_vmem [thread:$0]  %s731_s0, 4096, %s19_s22, [#allocation4], %s637_s24, %s637_s24, %s638_s25  }
   0xd   :  { %632 = dma.done.wait [#allocation4], 4096  }
   0xe   :  { %633 = vsyncadd [#allocation4], 4294963200  ;;  %v66_v0 = vld [vmem:[#allocation3 + $0x80] sm:$0xff]  ;;  %v82_v1 = vld [vmem:[#allocation3 + $0x88] sm:$0xff]  ;;  %v639_v48 = vmov 0.0   ;;  %vm640_vm0 = vmmov 0   ;;  %v252_v61 = vlaneseq }
   0xf   :  { %v58_v2 = vld [vmem:[#allocation3] sm:$0xff]  ;;  %v98_v3 = vadd.f32 %v82_v1, %v66_v0  ;;  %v74_v4 = vld [vmem:[#allocation3 + $0x8] sm:$0xff]  ;;  %v67_v5 = vld [vmem:[#allocation3 + $0x90] sm:$0xff]  ;;  %558 = vmatprep.subr.mxu0 %v639_v48  ;;  %577 = vmatprep.subr.mxu1 %v639_v48  ;;  %vm263_vm1 = vcmask 130112   ;;  %vm270_vm2 = vcmask 195712   ;;  %vm277_vm3 = vcmask 261312  }
  0x10   :  { %v83_v6 = vld [vmem:[#allocation3 + $0x98] sm:$0xff]  ;;  %v90_v7 = vadd.f32 %v74_v4, %v58_v2  ;;  %v59_v8 = vld [vmem:[#allocation3 + $0x10] sm:$0xff]  ;;  %v68_v12 = vld [vmem:[#allocation3 + $0xa0] sm:$0xff]  ;;  %574 = vmatprep.mubr.msk.f32.mxu0 %vm640_vm0, %v639_v48  ;;  %579 = vmatprep.mubr.msk.f32.mxu1 %vm640_vm0, %v639_v48  ;;  %v253_v0 = vand.u32 127, %v252_v61  ;;  %v255_v2 = vshrl.u32 %v252_v61, 7  ;;  %vm284_vm4 = vcmask 326912  }
  0x11   :  { %v75_v9 = vld [vmem:[#allocation3 + $0x18] sm:$0xff]  ;;  %189 = vadd.xlane.f32.xlu1 %v98_v3  ;;  %v99_v10 = vadd.f32 %v83_v6, %v67_v5  ;;  %v84_v13 = vld [vmem:[#allocation3 + $0xa8] sm:$0xff]  ;;  %v60_v14 = vld [vmem:[#allocation3 + $0x20] sm:$0xff]  ;;  %vm291_vm5 = vcmask 392512   ;;  %vm298_vm6 = vcmask 458112   ;;  %vm305_vm7 = vcmask 523712  }
  0x12   :  { %173 = vadd.xlane.f32.xlu0 %v90_v7  ;;  %v91_v11 = vadd.f32 %v75_v9, %v59_v8  ;;  %v76_v15 = vld [vmem:[#allocation3 + $0x28] sm:$0xff]  ;;  %v100_v16 = vadd.f32 %v84_v13, %v68_v12  ;;  %v69_v18 = vld [vmem:[#allocation3 + $0xb0] sm:$0xff]  ;;  %v85_v19 = vld [vmem:[#allocation3 + $0xb8] sm:$0xff]  ;;  %v258_v4 = vadd.s32 4294967288, %v253_v0  ;;  %v265_v5 = vadd.s32 4294967280, %v253_v0 }
  0x13   :  { %v92_v17 = vadd.f32 %v76_v15, %v60_v14  ;;  %v61_v20 = vld [vmem:[#allocation3 + $0x30] sm:$0xff]  ;;  %v77_v21 = vld [vmem:[#allocation3 + $0x38] sm:$0xff]  ;;  %v101_v22 = vadd.f32 %v85_v19, %v69_v18  ;;  %v70_v24 = vld [vmem:[#allocation3 + $0xc0] sm:$0xff]  ;;  %v272_v6 = vadd.s32 4294967272, %v253_v0  ;;  %v279_v7 = vadd.s32 4294967264, %v253_v0 }
  0x14   :  { %v93_v23 = vadd.f32 %v77_v21, %v61_v20  ;;  %v86_v25 = vld [vmem:[#allocation3 + $0xc8] sm:$0xff]  ;;  %v62_v26 = vld [vmem:[#allocation3 + $0x40] sm:$0xff]  ;;  %v71_v30 = vld [vmem:[#allocation3 + $0xd0] sm:$0xff]  ;;  %v286_v9 = vadd.s32 4294967256, %v253_v0  ;;  %v261_v12 = vsub.s32 %v258_v4, %v255_v2  ;;  %v268_v13 = vsub.s32 %v265_v5, %v255_v2 }
  0x15   :  { %191 = vadd.xlane.f32.xlu1 %v99_v10  ;;  %v78_v27 = vld [vmem:[#allocation3 + $0x48] sm:$0xff]  ;;  %v102_v28 = vadd.f32 %v86_v25, %v70_v24  ;;  %v87_v31 = vld [vmem:[#allocation3 + $0xd8] sm:$0xff]  ;;  %v63_v32 = vld [vmem:[#allocation3 + $0x50] sm:$0xff]  ;;  %v256_v10 = vsub.s32 %v253_v0, %v255_v2  ;;  %v293_v14 = vadd.s32 4294967248, %v253_v0  ;;  %vm346_vm8 = vcmask 1041409  }
  0x16   :  { %175 = vadd.xlane.f32.xlu0 %v91_v11  ;;  %v94_v29 = vadd.f32 %v78_v27, %v62_v26  ;;  %v79_v33 = vld [vmem:[#allocation3 + $0x58] sm:$0xff]  ;;  %v103_v34 = vadd.f32 %v87_v31, %v71_v30  ;;  %v72_v36 = vld [vmem:[#allocation3 + $0xe0] sm:$0xff]  ;;  %v88_v37 = vld [vmem:[#allocation3 + $0xe8] sm:$0xff]  ;;  %v289_v20 = vsub.s32 %v286_v9, %v255_v2  ;;  %vm348_vm9 = vcmask 523264  }
  0x17   :  { %v95_v35 = vadd.f32 %v79_v33, %v63_v32  ;;  %v64_v38 = vld [vmem:[#allocation3 + $0x60] sm:$0xff]  ;;  %v80_v39 = vld [vmem:[#allocation3 + $0x68] sm:$0xff]  ;;  %v104_v40 = vadd.f32 %v88_v37, %v72_v36  ;;  %v73_v42 = vld [vmem:[#allocation3 + $0xf0] sm:$0xff]  ;;  %v300_v33 = vadd.s32 4294967240, %v253_v0  ;;  %vm443_vm10 = vcmask 1043456  }
  0x18   :  { %v96_v41 = vadd.f32 %v80_v39, %v64_v38  ;;  %v89_v43 = vld [vmem:[#allocation3 + $0xf8] sm:$0xff]  ;;  %v65_v44 = vld [vmem:[#allocation3 + $0x70] sm:$0xff]  ;;  %v226_v51 = vld [vmem:[%s732_s1 + $0x28] sm:$0xff]  ;;  %vm439_vm12 = vcmask 31744   ;;  %vm523_vm13 = vcmask 517120  }
  0x19   :  { %193 = vadd.xlane.f32.xlu1 %v100_v16  ;;  %v81_v45 = vld [vmem:[#allocation3 + $0x78] sm:$0xff]  ;;  %v105_v46 = vadd.f32 %v89_v43, %v73_v42  ;;  %v227_v50 = vld [vmem:[%s732_s1 + $0x30] sm:$0xff]  ;;  %v225_v52 = vld [vmem:[%s732_s1 + $0x20] sm:$0xff]  ;;  %v275_v16 = vsub.s32 %v272_v6, %v255_v2 }
  0x1a   :  { %177 = vadd.xlane.f32.xlu0 %v92_v17  ;;  %v97_v47 = vadd.f32 %v81_v45, %v65_v44  ;;  %v228_v49 = vld [vmem:[%s732_s1 + $0x38] sm:$0xff]  ;;  %v223_v54 = vld [vmem:[%s732_s1 + $0x10] sm:$0xff]  ;;  %v222_v55 = vld [vmem:[%s732_s1 + $0x8] sm:$0xff]  ;;  %v282_v17 = vsub.s32 %v279_v7, %v255_v2 }
  0x1b   :  { %559 = vmatpush3.msra.mxu0 %v228_v49  ;;  %v224_v53 = vld [vmem:[%s732_s1 + $0x18] sm:$0xff]  ;;  %v221_v56 = vld [vmem:[%s732_s1] sm:$0xff] }
  0x1c   :  { %560 = vmatprep.subr.mxu0 %v639_v48 }
  0x1d   :  { %195 = vadd.xlane.f32.xlu1 %v101_v22  ;;  %561 = vmatpush3.msra.mxu0 %v227_v50  ;;  %v303_v50 = vsub.s32 %v300_v33, %v255_v2 }
  0x1e   :  { %179 = vadd.xlane.f32.xlu0 %v93_v23  ;;  %562 = vmatprep.subr.mxu0 %v639_v48 }
  0x1f   :  { %563 = vmatpush3.msra.mxu0 %v226_v51 }
  0x20   :  { %564 = vmatprep.subr.mxu0 %v639_v48 }
  0x21   :  { %197 = vadd.xlane.f32.xlu1 %v102_v28  ;;  %565 = vmatpush3.msra.mxu0 %v225_v52 }
  0x22   :  { %181 = vadd.xlane.f32.xlu0 %v94_v29  ;;  %566 = vmatprep.subr.mxu0 %v639_v48  ;;  %v296_v29 = vsub.s32 %v293_v14, %v255_v2 }
  0x23   :  { %567 = vmatpush3.msra.mxu0 %v224_v53 }
  0x24   :  { %568 = vmatprep.subr.mxu0 %v639_v48 }
  0x25   :  { %199 = vadd.xlane.f32.xlu1 %v103_v34  ;;  %569 = vmatpush3.msra.mxu0 %v223_v54 }
  0x26   :  { %183 = vadd.xlane.f32.xlu0 %v95_v35  ;;  %570 = vmatprep.subr.mxu0 %v639_v48 }
  0x27   :  { %571 = vmatpush3.msra.mxu0 %v222_v55 }
  0x28   :  { %572 = vmatprep.subr.mxu0 %v639_v48 }
  0x29   :  { %201 = vadd.xlane.f32.xlu1 %v104_v40  ;;  %573 = vmatpush3.msra.mxu0 %v221_v56 }
  0x2a   :  { %185 = vadd.xlane.f32.xlu0 %v96_v41 }
  0x2d   :  { %203 = vadd.xlane.f32.xlu1 %v105_v46 }
  0x2e   :  { %187 = vadd.xlane.f32.xlu0 %v97_v47 }
  0x9a   :  { %v190_v57 = vpop.xlane.xlu1 %189 }
  0x9b   :  { %v174_v58 = vpop.xlane.xlu0 %173  ;;  %v213_v22 = vmul.f32 0.00390625, %v190_v57 }
  0x9c   :  { %v205_v26 = vmul.f32 0.00390625, %v174_v58 }
  0x9d   :  { %v310_v38 = vrot.slane %v213_v22, %v256_v10 }
  0x9e   :  { %v192_v59 = vpop.xlane.xlu1 %191  ;;  %v257_v43 = vrot.slane %v205_v26, %v256_v10  ;;  %v431_v10 = vld [vmem:[%s735_s4] sm:$0xf] }
  0x9f   :  { %v176_v60 = vpop.xlane.xlu0 %175  ;;  %v214_v15 = vmul.f32 0.00390625, %v192_v59  ;;  %578 = vmatpush3.msk.msra.mxu1 %vm443_vm10, %v431_v10 }
  0xa0   :  { %v206_v18 = vmul.f32 0.00390625, %v176_v60 }
  0xa1   :  { %v314_v30 = vrot.slane %v214_v15, %v261_v12 }
  0xa2   :  { %v194_v62 = vpop.xlane.xlu1 %193  ;;  %v262_v34 = vrot.slane %v206_v18, %v261_v12  ;;  %v543_v18 = vld [vmem:[%s736_s5] ss:$0 sm:$0xff] }
  0xa3   :  { %v178_v63 = vpop.xlane.xlu0 %177  ;;  %v215_v19 = vmul.f32 0.00390625, %v194_v62  ;;  %v315_v47 = vsel %vm263_vm1, %v314_v30, %v310_v38 }
  0xa4   :  { %v207_v23 = vmul.f32 0.00390625, %v178_v63  ;;  %v264_v51 = vsel %vm263_vm1, %v262_v34, %v257_v43 }
  0xa5   :  { %v319_v35 = vrot.slane %v215_v19, %v268_v13 }
  0xa6   :  { %v196_v1 = vpop.xlane.xlu1 %195  ;;  %v269_v39 = vrot.slane %v207_v23, %v268_v13  ;;  %v542_v13 = vld [vmem:[%s734_s3] ss:$0 sm:$0xff] }
  0xa7   :  { %v180_v3 = vpop.xlane.xlu0 %179  ;;  %v216_v24 = vmul.f32 0.00390625, %v196_v1  ;;  %v320_v52 = vsel %vm270_vm2, %v319_v35, %v315_v47 }
  0xa8   :  { %v208_v27 = vmul.f32 0.00390625, %v180_v3  ;;  %v271_v56 = vsel %vm270_vm2, %v269_v39, %v264_v51 }
  0xa9   :  { %v324_v40 = vrot.slane %v216_v24, %v275_v16 }
  0xaa   :  { %v198_v8 = vpop.xlane.xlu1 %197  ;;  %v276_v44 = vrot.slane %v208_v27, %v275_v16 }
  0xab   :  { %v182_v11 = vpop.xlane.xlu0 %181  ;;  %v217_v28 = vmul.f32 0.00390625, %v198_v8  ;;  %v325_v57 = vsel %vm277_vm3, %v324_v40, %v320_v52 }
  0xac   :  { %v209_v31 = vmul.f32 0.00390625, %v182_v11  ;;  %v278_v61 = vsel %vm277_vm3, %v276_v44, %v271_v56  ;;  %v540_v11 = vld [vmem:[%s733_s2] ss:$0 sm:$0xff]  ;;  %s641_s2 = smov [#allocation6]  }
  0xad   :  { %v329_v45 = vrot.slane %v217_v28, %v282_v17  ;;  %s531_s3 = sshll.u32 %s641_s2, 4  ;;  %s532_s3 = int_to_ptr.vmem [resolvable:$true] %s531_s3 }
  0xae   :  { %v200_v21 = vpop.xlane.xlu1 %199  ;;  %v283_v48 = vrot.slane %v209_v31, %v282_v17  ;;  %s612_s25 = scalar_lea.vmem %s532_s3, 32  ;;  %p617_p6 = scmp.lt.s32.totalorder %s532_s3, %s532_s3 }
  0xaf   :  { %v184_v25 = vpop.xlane.xlu0 %183  ;;  %v218_v32 = vmul.f32 0.00390625, %v200_v21  ;;  %v330_v62 = vsel %vm284_vm4, %v329_v45, %v325_v57  ;;  %p613_p5 = scmp.ne.s32.totalorder %s532_s3, %s612_s25  ;;  %p618_p7 = scmp.lt.s32.totalorder %s612_s25, %s612_s25 }
  0xb0   :  { %v210_v36 = vmul.f32 0.00390625, %v184_v25  ;;  %v285_v0 = vsel %vm284_vm4, %v283_v48, %v278_v61 }
  0xb1   :  { %v334_v49 = vrot.slane %v218_v32, %v289_v20  ;;  %p619_p8 = por %p618_p7, %p617_p6 }
  0xb2   :  { %v202_v37 = vpop.xlane.xlu1 %201  ;;  %v290_v53 = vrot.slane %v210_v36, %v289_v20 }
  0xb3   :  { %v219_v41 = vmul.f32 0.00390625, %v202_v37  ;;  %v186_v42 = vpop.xlane.xlu0 %185  ;;  %v335_v1 = vsel %vm291_vm5, %v334_v49, %v330_v62  ;;  %p620_p9 = pnand %p619_p8, %p613_p5 }
  0xb4   :  { %v211_v46 = vmul.f32 0.00390625, %v186_v42  ;;  %v292_v3 = vsel %vm291_vm5, %v290_v53, %v285_v0 }
  0xb5   :  { %v339_v54 = vrot.slane %v219_v41, %v296_v29 }
  0xb6   :  { %v204_v55 = vpop.xlane.xlu1 %203  ;;  %v297_v58 = vrot.slane %v211_v46, %v296_v29 }
  0xb7   :  { %v220_v59 = vmul.f32 0.00390625, %v204_v55  ;;  %v188_v60 = vpop.xlane.xlu0 %187  ;;  %v340_v4 = vsel %vm298_vm6, %v339_v54, %v335_v1 }
  0xb8   :  { %v212_v63 = vmul.f32 0.00390625, %v188_v60  ;;  %v299_v6 = vsel %vm298_vm6, %v297_v58, %v292_v3 }
  0xb9   :  { %v344_v2 = vrot.slane %v220_v59, %v303_v50 }
  0xba   :  { %v304_v5 = vrot.slane %v212_v63, %v303_v50 }
  0xbb   :  { %v345_v7 = vsel %vm305_vm7, %v344_v2, %v340_v4 }
  0xbc   :  { %v306_v8 = vsel %vm305_vm7, %v304_v5, %v299_v6 }
  0xbd   :  { %v347_v9 = vsel %vm346_vm8, %v345_v7, %v306_v8 }
  0xbe   :  { %575 = vmatmul.mubr.msk.f32.vlgmr.msra.gmra.mxu0 %vm348_vm9, %v347_v9 }
 0x17e   :  { %v417_v12 = vpop.f32.mrf.mxu0 }
 0x17f   :  { %v418_v14 = vadd.f32 %v540_v11, %v417_v12 }
 0x180   :  { %v576_v15 = vpop.f32.mrf.mxu0 }
 0x181   :  { %vm421_vm11 = vcmp.gt.f32.partialorder %v418_v14, 0.0  ;;  %v429_v16 = vmul.f32 %v542_v13, %v418_v14 }
 0x183   :  { %v430_v17 = vsel %vm421_vm11, %v418_v14, %v429_v16 }
 0x184   :  { %580 = vmatmul.mubr.msk.f32.vlgmr.msra.gmra.mxu1 %vm439_vm12, %v430_v17 }
 0x244   :  { %v513_v19 = vpop.f32.mrf.mxu1 }
 0x245   :  { %v514_v20 = vadd.f32 %v543_v18, %v513_v19 }
 0x246   :  { %v581_v21 = vpop.f32.mrf.mxu1 }
 0x247   :  { %v546_v22 = vmul.f32 -1.442695, %v514_v20 }
 0x249   :  { %588 = vpow2.f32 %v546_v22 }
 0x256   :  { %v589_v23 = vpop.eup %588 }
 0x257   :  { %v520_v24 = vadd.f32 1.0, %v589_v23 }
 0x259   :  { %590 = vrcp.f32 %v520_v24 }
 0x266   :  { %v591_v25 = vpop.eup %590 }
 0x267   :  { %524 = vst.msk [vmem:[#allocation6] sm:$0x3] %vm523_vm13, %v591_v25 }
 0x268   :  { %623 = shalt.err (!%p620_p9)
}
 0x269   :  { %534 = dma.vmem_to_hbm [thread:$0]  %s532_s3, 32, %s737_s6, [#allocation5]  }
 0x26a   :  { %634 = dma.done.wait [#allocation5], 32  }
 0x26b   :  { %635 = vsyncadd [#allocation5], 4294967264 }
 0x26c   :  { %538 = vsyncpa [#allocation4], 1 }
 0x26d   :  { %539 = vsyncpa [#allocation5], 1 }

</bundles_post_ra>
